<compile_context>
chip_gen: v7x
topology: tpu7x:2x2x1
jax: 0.10.0
libtpu: 0.0.40
codegen_flags: <defaults>
</compile_context>

<pallas_src>
import functools

import jax
import jax.numpy as jnp
import numpy as np
from jax.experimental import pallas as pl
from jax.experimental.pallas import tpu as pltpu


# ----------------------------------------------------------------------------
# Kernel: single step, everything resident in VMEM.
# ----------------------------------------------------------------------------
def _attention_head_kernel(
    x_ref,      # (B*T, E)      activations, batch folded into M
    wq_ref,     # (E, hs)
    wk_ref,     # (E, hs)
    wv_ref,     # (E, hs)
    mask_ref,   # (B*T, B*T)    block-diagonal causal mask (1.0 = keep)
    o_ref,      # (B*T, hs)
    *,
    head_size: int,
):
    x = x_ref[...]                                                       # (BT, E)

    # q/k/v projections: one 2-D MXU matmul each, M = B*T.
    q = jnp.dot(x, wq_ref[...], preferred_element_type=jnp.float32)     # (BT, hs)
    k = jnp.dot(x, wk_ref[...], preferred_element_type=jnp.float32)
    v = jnp.dot(x, wv_ref[...], preferred_element_type=jnp.float32)

    # Scores over the folded (B*T) axis; block-diagonal mask keeps batches apart
    # and enforces causality inside each batch.
    s = jnp.dot(q, k.T, preferred_element_type=jnp.float32) * (head_size ** -0.5)
    s = jnp.where(mask_ref[...] > 0, s, -1e30)          # finite sentinel, not -inf

    # Numerically stable softmax with an exact denominator (VPU divide).
    # (approx EUP reciprocal was the source of the previous tolerance failure.)
    s = s - jnp.max(s, axis=-1, keepdims=True)
    p = jnp.exp(s)
    p = p / jnp.sum(p, axis=-1, keepdims=True)

    o_ref[...] = jnp.dot(p, v, preferred_element_type=jnp.float32).astype(o_ref.dtype)


# ----------------------------------------------------------------------------
# Wrapper
# ----------------------------------------------------------------------------
def attention_head(x, wq, wk, wv):
    """x: (B, T, E); wq/wk/wv: (E, head_size). Returns (B, T, head_size)."""
    B, T, E = x.shape
    hs = wq.shape[1]
    BT = B * T

    # Fold batch into the matmul M dimension.
    x2 = x.reshape(BT, E)

    # Block-diagonal causal mask: key j is visible to query i iff they belong to
    # the same batch element and j <= i within that element.
    mask = jnp.kron(jnp.eye(B, dtype=jnp.float32),
                    jnp.tril(jnp.ones((T, T), jnp.float32)))             # (BT, BT)

    vmem = pl.BlockSpec(memory_space=pltpu.MemorySpace.VMEM)

    out2 = pl.pallas_call(
        functools.partial(_attention_head_kernel, head_size=hs),
        out_shape=jax.ShapeDtypeStruct((BT, hs), x.dtype),
        in_specs=[vmem, vmem, vmem, vmem, vmem],
        out_specs=vmem,
    )(x2, wq, wk, wv, mask)

    return out2.reshape(B, T, hs)


# ----------------------------------------------------------------------------
# Pure-JAX reference (mirrors the PyTorch forward in eval mode)
# ----------------------------------------------------------------------------
def attention_head_ref(x, wq, wk, wv):
    B, T, E = x.shape
    hs = wq.shape[1]
    q = x @ wq
    k = x @ wk
    v = x @ wv
    s = (q @ jnp.swapaxes(k, -2, -1)) * (hs ** -0.5)
    causal = jnp.tril(jnp.ones((T, T), bool))
    s = jnp.where(causal, s, -jnp.inf)
    p = jax.nn.softmax(s, axis=-1)
    return p @ v


# ----------------------------------------------------------------------------
# Main
# ----------------------------------------------------------------------------
if __name__ == "__main__":
    B, T = 2, 8          # batch, context_size
    E = 32               # embed_size
    HS = 8               # head_size

    key = jax.random.PRNGKey(0)
    kx, kq, kk, kv = jax.random.split(key, 4)

    w_scale = E ** -0.5
    wq = jax.random.normal(kq, (E, HS), jnp.float32) * w_scale
    wk = jax.random.normal(kk, (E, HS), jnp.float32) * w_scale
    wv = jax.random.normal(kv, (E, HS), jnp.float32) * w_scale
    x = jax.random.normal(kx, (B, T, E), jnp.float32)

    out = attention_head(x, wq, wk, wv)
    out = jax.block_until_ready(out)

    ref = attention_head_ref(x, wq, wk, wv)
    np.testing.assert_allclose(np.asarray(out), np.asarray(ref), rtol=2e-3, atol=2e-3)

    print("KERNEL_OK")
</pallas_src>

<mosaic_0001>
module attributes {stable_mosaic.version = 11 : i64} {
  func.func @_attention_head_kernel(%arg0: memref<16x32xf32, #tpu.memory_space<vmem>>, %arg1: memref<32x8xf32, #tpu.memory_space<vmem>>, %arg2: memref<32x8xf32, #tpu.memory_space<vmem>>, %arg3: memref<32x8xf32, #tpu.memory_space<vmem>>, %arg4: memref<16x16xf32, #tpu.memory_space<vmem>>, %arg5: memref<16x8xf32, #tpu.memory_space<vmem>>) attributes {dimension_semantics = [], scalar_prefetch = 0 : i64, scratch_operands = 0 : i64, tpu.core_type = #tpu.core_type<tc>} {
    %c0 = arith.constant 0 : index
    %c0_0 = arith.constant 0 : index
    %0 = vector.load %arg0[%c0, %c0_0] : memref<16x32xf32, #tpu.memory_space<vmem>>, vector<16x32xf32>
    %c0_1 = arith.constant 0 : index
    %c0_2 = arith.constant 0 : index
    %1 = vector.load %arg1[%c0_1, %c0_2] : memref<32x8xf32, #tpu.memory_space<vmem>>, vector<32x8xf32>
    %cst = arith.constant dense<0.000000e+00> : vector<16x8xf32>
    %2 = tpu.matmul %0, %1, %cst {dimension_numbers = #tpu.dot_dimension_numbers<[1], [0], [0], [1], [0, 0, 1, 1], [], []>} : vector<16x32xf32>, vector<32x8xf32>, vector<16x8xf32> -> vector<16x8xf32>
    %c0_3 = arith.constant 0 : index
    %c0_4 = arith.constant 0 : index
    %3 = vector.load %arg2[%c0_3, %c0_4] : memref<32x8xf32, #tpu.memory_space<vmem>>, vector<32x8xf32>
    %cst_5 = arith.constant dense<0.000000e+00> : vector<16x8xf32>
    %4 = tpu.matmul %0, %3, %cst_5 {dimension_numbers = #tpu.dot_dimension_numbers<[1], [0], [0], [1], [0, 0, 1, 1], [], []>} : vector<16x32xf32>, vector<32x8xf32>, vector<16x8xf32> -> vector<16x8xf32>
    %c0_6 = arith.constant 0 : index
    %c0_7 = arith.constant 0 : index
    %5 = vector.load %arg3[%c0_6, %c0_7] : memref<32x8xf32, #tpu.memory_space<vmem>>, vector<32x8xf32>
    %cst_8 = arith.constant dense<0.000000e+00> : vector<16x8xf32>
    %6 = tpu.matmul %0, %5, %cst_8 {dimension_numbers = #tpu.dot_dimension_numbers<[1], [0], [0], [1], [0, 0, 1, 1], [], []>} : vector<16x32xf32>, vector<32x8xf32>, vector<16x8xf32> -> vector<16x8xf32>
    %7 = tpu.transpose %4, [1, 0] : vector<16x8xf32> -> vector<8x16xf32>
    %cst_9 = arith.constant dense<0.000000e+00> : vector<16x16xf32>
    %8 = tpu.matmul %2, %7, %cst_9 {dimension_numbers = #tpu.dot_dimension_numbers<[1], [0], [0], [1], [0, 0, 1, 1], [], []>} : vector<16x8xf32>, vector<8x16xf32>, vector<16x16xf32> -> vector<16x16xf32>
    %cst_10 = arith.constant 0.353553385 : f32
    %9 = vector.broadcast %cst_10 : f32 to vector<16x16xf32>
    %10 = arith.mulf %8, %9 : vector<16x16xf32>
    %c0_11 = arith.constant 0 : index
    %c0_12 = arith.constant 0 : index
    %11 = vector.load %arg4[%c0_11, %c0_12] : memref<16x16xf32, #tpu.memory_space<vmem>>, vector<16x16xf32>
    %cst_13 = arith.constant 0.000000e+00 : f32
    %12 = vector.broadcast %cst_13 : f32 to vector<16x16xf32>
    %13 = arith.cmpf ogt, %11, %12 : vector<16x16xf32>
    %cst_14 = arith.constant -1.000000e+30 : f32
    %14 = vector.broadcast %cst_14 : f32 to vector<16x16xf32>
    %15 = arith.select %13, %10, %14 : vector<16x16xi1>, vector<16x16xf32>
    %cst_15 = arith.constant dense<0xFF800000> : vector<16xf32>
    %16 = vector.multi_reduction <maximumf>, %15, %cst_15 [1] : vector<16x16xf32> to vector<16xf32>
    %17 = vector.shape_cast %16 : vector<16xf32> to vector<16x1xf32>
    %18 = vector.broadcast %17 : vector<16x1xf32> to vector<16x16xf32>
    %19 = arith.subf %15, %18 : vector<16x16xf32>
    %20 = math.exp %19 : vector<16x16xf32>
    %cst_16 = arith.constant dense<0.000000e+00> : vector<16xf32>
    %21 = vector.multi_reduction <add>, %20, %cst_16 [1] : vector<16x16xf32> to vector<16xf32>
    %22 = vector.shape_cast %21 : vector<16xf32> to vector<16x1xf32>
    %23 = vector.broadcast %22 : vector<16x1xf32> to vector<16x16xf32>
    %24 = arith.divf %20, %23 : vector<16x16xf32>
    %cst_17 = arith.constant dense<0.000000e+00> : vector<16x8xf32>
    %25 = tpu.matmul %24, %6, %cst_17 {dimension_numbers = #tpu.dot_dimension_numbers<[1], [0], [0], [1], [0, 0, 1, 1], [], []>} : vector<16x16xf32>, vector<16x8xf32>, vector<16x8xf32> -> vector<16x8xf32>
    %c0_18 = arith.constant 0 : index
    %c0_19 = arith.constant 0 : index
    %26 = vector.load %arg5[%c0_18, %c0_19] : memref<16x8xf32, #tpu.memory_space<vmem>>, vector<16x8xf32>
    tpu.vector_store %arg5[%c0_18, %c0_19], %25 {strides = array<i32>} : memref<16x8xf32, #tpu.memory_space<vmem>>, vector<16x8xf32>,
    return
  }
}

</mosaic_0001>

<bundles_post_ra>
// kernel: tpu_custom_call.1
= control target key start
LH: loop header
LB: loop body
LE: loop exit
PB: predicated region body
PF: predicated region fallthrough
CT: control target
= control target key end

     0   :  { %vm26_vm0 = vcmask 261120   ;;  %vm266_vm1 = vcmask 64512   ;;  %vm362_vm4 = vcmask 130048   ;;  %s701_s2 = inlined_call_operand.vmem [shape: f32[32,8], index: 2, kind: input, shape index: {}]   ;;  %s702_s0 = inlined_call_operand.vmem [shape: f32[16,32], index: 0, kind: input, shape index: {}]   ;;  %s703_s1 = inlined_call_operand.vmem [shape: f32[32,8], index: 1, kind: input, shape index: {}]   ;;  %s704_s3 = inlined_call_operand.vmem [shape: f32[32,8], index: 3, kind: input, shape index: {}]   ;;  %s705_s4 = inlined_call_operand.vmem [shape: f32[16,16], index: 4, kind: input, shape index: {}]   ;;  %s706_s5 = inlined_call_operand.vmem [shape: f32[16,8], index: 5, kind: output, shape index: {}]  }
   0x1   :  { %v108_v0 = vld [vmem:[%s701_s2] sm:$0xff]  ;;  %v109_v1 = vld [vmem:[%s701_s2 + $0x8] sm:$0xff]  ;;  %v110_v2 = vld [vmem:[%s701_s2 + $0x10] sm:$0xff] }
   0x2   :  { %v565_v3 = vpack.c.bf16 %v109_v1, %v108_v0  ;;  %v111_v4 = vld [vmem:[%s701_s2 + $0x18] sm:$0xff]  ;;  %v20_v5 = vld [vmem:[%s702_s0] sm:$0xff]  ;;  %v23_v8 = vld [vmem:[%s703_s1 + $0x8] sm:$0xff] }
   0x3   :  { %v22_v6 = vld [vmem:[%s703_s1] sm:$0xff]  ;;  %v569_v7 = vpack.c.bf16 %v111_v4, %v110_v2  ;;  %529 = vmatprep.mubr.msk.f32.mxu1 %vm26_vm0, %v20_v5  ;;  %v24_v9 = vld [vmem:[%s703_s1 + $0x10] sm:$0xff]  ;;  %518 = vmatprep.mubr.msk.f32.mxu0 %vm26_vm0, %v20_v5  ;;  %v25_v11 = vld [vmem:[%s703_s1 + $0x18] sm:$0xff] }
   0x4   :  { %566 = vmatprep.subr.bf16.mxu1 %v565_v3  ;;  %v557_v10 = vpack.c.bf16 %v23_v8, %v22_v6  ;;  %v561_v12 = vpack.c.bf16 %v25_v11, %v24_v9  ;;  %v21_v13 = vld [vmem:[%s702_s0 + $0x8] sm:$0xff]  ;;  %vm582_vm2 = vmpackc.low %vm266_vm1, %vm266_vm1  ;;  %v187_v19 = vld [vmem:[%s704_s3] sm:$0xff] }
   0x5   :  { %568 = vmatpush3.bf16.msra.mxu1 %v565_v3  ;;  %v188_v20 = vld [vmem:[%s704_s3 + $0x8] sm:$0xff]  ;;  %v189_v21 = vld [vmem:[%s704_s3 + $0x10] sm:$0xff]  ;;  %v190_v23 = vld [vmem:[%s704_s3 + $0x18] sm:$0xff] }
   0x6   :  { %570 = vmatprep.subr.bf16.mxu1 %v569_v7  ;;  %558 = vmatprep.subr.bf16.mxu0 %v557_v10  ;;  %v573_v22 = vpack.c.bf16 %v188_v20, %v187_v19  ;;  %v577_v24 = vpack.c.bf16 %v190_v23, %v189_v21  ;;  %v356_v25 = vld [vmem:[%s705_s4] sm:$0xff]  ;;  %v357_v27 = vld [vmem:[%s705_s4 + $0x8] sm:$0xff] }
   0x7   :  { %560 = vmatpush3.bf16.msra.mxu0 %v557_v10  ;;  %vm358_vm3 = vcmp.gt.f32.partialorder %v356_v25, 0.0  ;;  %vm359_vm5 = vcmp.gt.f32.partialorder %v357_v27, 0.0 }
   0x8   :  { %562 = vmatprep.subr.bf16.mxu0 %v561_v12 }
   0x9   :  { %572 = vmatpush3.bf16.msra.mxu1 %v569_v7 }
   0xb   :  { %564 = vmatpush3.bf16.msra.mxu0 %v561_v12 }
   0xc   :  { %530 = vmatmul.mubr.msk.f32.vlgmr.msra.gmra.mrb[0].mxu1 %vm26_vm0, %v21_v13  ;;  %574 = vmatprep.subr.bf16.mxu0 %v573_v22 }
   0xe   :  { %519 = vmatmul.mubr.msk.f32.vlgmr.msra.gmra.mrb[0].mxu0 %vm26_vm0, %v21_v13 }
   0xf   :  { %540 = vmatprep.mubr.msk.f32.mxu0 %vm26_vm0, %v20_v5  ;;  %576 = vmatpush3.bf16.msra.mxu0 %v573_v22 }
  0x10   :  { %578 = vmatprep.subr.bf16.mxu0 %v577_v24 }
  0x13   :  { %580 = vmatpush3.bf16.msra.mxu0 %v577_v24 }
  0x16   :  { %541 = vmatmul.mubr.msk.f32.vlgmr.msra.gmra.mrb[2].mxu0 %vm26_vm0, %v21_v13 }
  0xdf   :  { %v531_v14 = vpop.f32.mrb[0].mxu1 }
  0xe0   :  { %v178_v15 = vpop.f32.mrb[1].mxu1 }
  0xe1   :  { %v581_v16 = vpack.c.bf16 %v531_v14, %v178_v15  ;;  %v520_v17 = vpop.f32.mrb[0].mxu0 }
  0xe2   :  { %v99_v18 = vpop.f32.mrb[1].mxu0 }
  0xe3   :  { %583 = vmatprep.subr.msk.bf16.mxu1 %vm582_vm2, %v581_v16  ;;  %547 = vmatprep.mubr.msk.f32.mxu1 %vm266_vm1, %v99_v18 }
  0xe4   :  { %586 = vmatpush3.bf16.xpose.msk.msra.mxu1 %vm582_vm2, %v581_v16 }
  0xe9   :  { %v542_v45 = vpop.f32.mrb[2].mxu0 }
  0xea   :  { %v257_v46 = vpop.f32.mrb[3].mxu0 }
  0xeb   :  { %548 = vmatmul.mubr.msk.f32.vlgmr.msra.gmra.mrb[2].mxu1 %vm266_vm1, %v520_v17  ;;  %v587_v47 = vpack.c.bf16 %v542_v45, %v257_v46 }
  0xed   :  { %588 = vmatprep.subr.bf16.mxu0 %v587_v47 }
  0xee   :  { %590 = vmatpush3.bf16.msra.mxu0 %v587_v47 }
 0x1be   :  { %v549_v26 = vpop.f32.mrb[2].mxu1 }
 0x1bf   :  { %v345_v28 = vpop.f32.mrb[3].mxu1  ;;  %v355_v29 = vmul.f32 0.35355338, %v549_v26 }
 0x1c0   :  { %v354_v30 = vmul.f32 0.35355338, %v345_v28 }
 0x1c1   :  { %v361_v33 = vsel %vm359_vm5, %v355_v29, -1e+30 }
 0x1c2   :  { %v360_v31 = vsel %vm358_vm3, %v354_v30, -1e+30  ;;  %v366_v34 = vsel %vm362_vm4, %v361_v33, -inf }
 0x1c3   :  { %v363_v32 = vsel %vm362_vm4, %v360_v31, -inf }
 0x1c4   :  { %364 = vmax.xlane.f32.xlu0 %v363_v32 }
 0x1c8   :  { %367 = vmax.xlane.f32.xlu0 %v366_v34 }
 0x251   :  { %v365_v35 = vpop.xlane.xlu0 %364 }
 0x252   :  { %v369_v36 = vsub.f32 %v360_v31, %v365_v35 }
 0x254   :  { %v371_v37 = vmul.f32 1.442695, %v369_v36 }
 0x255   :  { %v368_v38 = vpop.xlane.xlu0 %367 }
 0x256   :  { %591 = vpow2.f32 %v371_v37  ;;  %v370_v39 = vsub.f32 %v361_v33, %v368_v38 }
 0x258   :  { %v373_v40 = vmul.f32 1.442695, %v370_v39 }
 0x25a   :  { %593 = vpow2.f32 %v373_v40 }
 0x260   :  { %v592_v41 = vpop.eup %591 }
 0x261   :  { %v375_v42 = vsel %vm362_vm4, %v592_v41, 0.0 }
 0x262   :  { %376 = vadd.xlane.f32.xlu1 %v375_v42 }
 0x264   :  { %v594_v43 = vpop.eup %593 }
 0x265   :  { %v378_v44 = vsel %vm362_vm4, %v594_v43, 0.0 }
 0x266   :  { %379 = vadd.xlane.f32.xlu1 %v378_v44 }
 0x2ef   :  { %v377_v48 = vpop.xlane.xlu1 %376 }
 0x2f0   :  { %595 = vrcp.f32 %v377_v48 }
 0x2f3   :  { %v380_v49 = vpop.xlane.xlu1 %379 }
 0x2f4   :  { %597 = vrcp.f32 %v380_v49 }
 0x2fa   :  { %v596_v50 = vpop.eup %595 }
 0x2fb   :  { %v382_v51 = vmul.f32 %v596_v50, %v592_v41 }
 0x2fd   :  { %554 = vmatprep.mubr.msk.f32.mxu0 %vm362_vm4, %v382_v51 }
 0x2fe   :  { %v598_v52 = vpop.eup %597 }
 0x2ff   :  { %v384_v53 = vmul.f32 %v598_v52, %v594_v43 }
 0x301   :  { %555 = vmatmul.mubr.msk.f32.vlgmr.msra.gmra.mrb[4].mxu0 %vm362_vm4, %v384_v53 }
 0x3d4   :  { %v556_v54 = vpop.f32.mrb[4].mxu0 }
 0x3d5   :  { %467 = vst.msk [vmem:[%s706_s5 + $0x8] sm:$0xff] %vm266_vm1, %v556_v54  ;;  %v457_v55 = vpop.f32.mrb[5].mxu0 }
 0x3d6   :  { %466 = vst.msk [vmem:[%s706_s5] sm:$0xff] %vm266_vm1, %v457_v55 }

</bundles_post_ra>
